<compile_context>
chip_gen: v5e
topology: v5e:2x2
jax: 0.10.0
libtpu: 0.0.40
codegen_flags: <defaults>
</compile_context>

<pallas_src>
import math
import functools

import jax
import jax.numpy as jnp
from jax.experimental import pallas as pl
from jax.experimental.pallas import tpu as pltpu


def _round_up(x: int, m: int) -> int:
    return ((x + m - 1) // m) * m


def _mlp_kernel(x_ref, w1t_ref, b1_ref, w2t_ref, b2_ref, o_ref):
    """Fused Linear -> ReLU -> Linear on one batch tile (weights VMEM-resident)."""
    x = x_ref[...]                                                       # [TB, inp]
    a1 = jnp.dot(x, w1t_ref[...], preferred_element_type=jnp.float32)    # [TB, hid] f32 acc
    a1 = a1 + b1_ref[...]                                                # bias broadcast (f32)
    z1 = jnp.maximum(a1, 0.0)                                            # ReLU on f32 (VPU)
    z1 = z1.astype(w2t_ref.dtype)                                        # downcast only on bf16 path
    a2 = jnp.dot(z1, w2t_ref[...], preferred_element_type=jnp.float32)   # [TB, out] f32 acc
    o_ref[...] = (a2 + b2_ref[...]).astype(o_ref.dtype)


def prepare_params(w1, b1, w2, b2, compute_dtype=jnp.float32):
    """
    One-time (model-load) preparation: transpose weights to [in, out] layout, cast once.
      w1: [hid, inp], b1: [hid], w2: [out, hid], b2: [out]  (PyTorch nn.Linear convention)
    No feature-dim padding: weights are tiny and VMEM-resident, so native widths are fine.
    """
    w1t = jnp.transpose(w1).astype(compute_dtype)        # [inp, hid]
    b1r = b1.astype(jnp.float32).reshape(1, -1)          # [1, hid]  (bias/ReLU stay f32)
    w2t = jnp.transpose(w2).astype(compute_dtype)        # [hid, out]
    b2r = b2.astype(jnp.float32).reshape(1, -1)          # [1, out]
    return (w1t, b1r, w2t, b2r)


@functools.partial(jax.jit, static_argnames=("batch_tile",))
def neural_sentiment_forward(x, params, *, batch_tile: int = 1024):
    """
    x:      [B, inp] float32 (averaged word embeddings, i.e. sentence2matirx output)
    params: output of prepare_params()
    returns logits [B, out] float32
    """
    w1t, b1r, w2t, b2r = params
    B, inp = x.shape                       # static Python ints (shapes are static under jit)
    hid = w1t.shape[1]
    out = w2t.shape[1]
    compute_dtype = w1t.dtype

    x = x.astype(compute_dtype)            # no-op on the f32 path

    # Batch tile: multiple of 8 sublanes. Cap so the grid keeps >= 4 steps on large B
    # (two steps per TensorCore on v7x); fall back to a single >=8-row tile for tiny B.
    TB = min(batch_tile, _round_up(max(pl.cdiv(B, 4), 1), 8))
    TB = max(8, _round_up(TB, 8))
    grid = (pl.cdiv(B, TB),)               # ragged last tile: OOB output rows are discarded

    logits = pl.pallas_call(
        _mlp_kernel,
        out_shape=jax.ShapeDtypeStruct((B, out), jnp.float32),
        grid=grid,
        in_specs=[
            pl.BlockSpec((TB, inp), lambda i: (i, 0)),     # x: tiled over batch, native width
            pl.BlockSpec((inp, hid), lambda i: (0, 0)),    # w1t: resident (full-array block)
            pl.BlockSpec((1, hid), lambda i: (0, 0)),      # b1:  resident
            pl.BlockSpec((hid, out), lambda i: (0, 0)),    # w2t: resident
            pl.BlockSpec((1, out), lambda i: (0, 0)),      # b2:  resident
        ],
        out_specs=pl.BlockSpec((TB, out), lambda i: (i, 0)),   # native class width (out=2)
        compiler_params=pltpu.CompilerParams(
            dimension_semantics=("parallel",),             # shard batch tiles across TCs (v7x)
        ),
    )(x, w1t, b1r, w2t, b2r)

    return logits


def _xavier_uniform(key, shape):
    # nn.init.xavier_uniform_: U(-a, a), a = sqrt(6 / (fan_in + fan_out)), shape = (fan_out, fan_in)
    fan_out, fan_in = shape
    a = math.sqrt(6.0 / (fan_in + fan_out))
    return jax.random.uniform(key, shape, minval=-a, maxval=a, dtype=jnp.float32)


def _linear_bias(key, fan_in, n):
    # default nn.Linear bias init: U(-1/sqrt(fan_in), 1/sqrt(fan_in))
    bound = 1.0 / math.sqrt(fan_in)
    return jax.random.uniform(key, (n,), minval=-bound, maxval=bound, dtype=jnp.float32)


if __name__ == "__main__":
    # Small shapes consistent with the module: inp = embedding dim, hid = hidden, out = 2 classes.
    B, INP, HID, OUT = 2, 32, 32, 2

    key = jax.random.PRNGKey(0)
    k_x, k_w1, k_b1, k_w2, k_b2 = jax.random.split(key, 5)

    # x plays the role of the averaged-embedding sentence vectors (sentence2matirx output).
    x = jax.random.normal(k_x, (B, INP), dtype=jnp.float32)

    w1 = _xavier_uniform(k_w1, (HID, INP))   # firstLayer.weight
    b1 = _linear_bias(k_b1, INP, HID)        # firstLayer.bias
    w2 = _xavier_uniform(k_w2, (OUT, HID))   # OutPutLayer.weight
    b2 = _linear_bias(k_b2, HID, OUT)        # OutPutLayer.bias

    # Pure-JAX reference (same math as the PyTorch forward).
    ref = jnp.maximum(x @ w1.T + b1, 0.0) @ w2.T + b2

    # f32 path: bit-faithful to the module.
    params_f32 = prepare_params(w1, b1, w2, b2, compute_dtype=jnp.float32)
    logits = jax.block_until_ready(neural_sentiment_forward(x, params_f32))
    assert logits.shape == (B, OUT)
    assert jnp.allclose(logits, ref, atol=1e-5, rtol=1e-5), "f32 mismatch vs reference"

    # bf16 path: halves HBM bytes for the memory-bound case (looser tolerance expected).
    params_bf16 = prepare_params(w1, b1, w2, b2, compute_dtype=jnp.bfloat16)
    logits_bf16 = jax.block_until_ready(neural_sentiment_forward(x, params_bf16))
    assert jnp.allclose(logits_bf16, ref, atol=1e-2, rtol=1e-2), "bf16 mismatch vs reference"

    # predict() equivalent (argmax over class dim) — done in glue, not the kernel.
    _preds = jnp.argmax(logits, axis=1)

    # TODO(synk): sentence2matirx (per-word embedding lookup + average) stays host/XLA-side;
    # it is a ragged python-loop gather in the original module, not a fixed-shape kernel op.

    print("KERNEL_OK")
</pallas_src>

<mosaic_0001>
module attributes {stable_mosaic.version = 11 : i64} {
  func.func @_mlp_kernel(%arg0: i32, %arg1: memref<8x32xf32, #tpu.memory_space<vmem>>, %arg2: memref<32x32xf32, #tpu.memory_space<vmem>>, %arg3: memref<1x32xf32, #tpu.memory_space<vmem>>, %arg4: memref<32x2xf32, #tpu.memory_space<vmem>>, %arg5: memref<1x2xf32, #tpu.memory_space<vmem>>, %arg6: memref<8x2xf32, #tpu.memory_space<vmem>>) attributes {dimension_semantics = [#tpu.dimension_semantics<parallel>], iteration_bounds = array<i64: 1>, scalar_prefetch = 0 : i64, scratch_operands = 0 : i64, tpu.core_type = #tpu.core_type<tc>, window_params = [{transform_indices = @transform_0, window_bounds = array<i64: 8, 32>}, {pipeline_mode = #tpu.pipeline_mode<synchronous>, transform_indices = @transform_1, window_bounds = array<i64: 32, 32>}, {pipeline_mode = #tpu.pipeline_mode<synchronous>, transform_indices = @transform_2, window_bounds = array<i64: 1, 32>}, {pipeline_mode = #tpu.pipeline_mode<synchronous>, transform_indices = @transform_3, window_bounds = array<i64: 32, 2>}, {pipeline_mode = #tpu.pipeline_mode<synchronous>, transform_indices = @transform_4, window_bounds = array<i64: 1, 2>}, {transform_indices = @transform_5, window_bounds = array<i64: 8, 2>}]} {
    %c0 = arith.constant 0 : index
    %c0_0 = arith.constant 0 : index
    %0 = vector.load %arg1[%c0, %c0_0] : memref<8x32xf32, #tpu.memory_space<vmem>>, vector<8x32xf32>
    %c0_1 = arith.constant 0 : index
    %c0_2 = arith.constant 0 : index
    %1 = vector.load %arg2[%c0_1, %c0_2] : memref<32x32xf32, #tpu.memory_space<vmem>>, vector<32x32xf32>
    %cst = arith.constant dense<0.000000e+00> : vector<8x32xf32>
    %2 = tpu.matmul %0, %1, %cst {dimension_numbers = #tpu.dot_dimension_numbers<[1], [0], [0], [1], [0, 0, 1, 1], [], []>} : vector<8x32xf32>, vector<32x32xf32>, vector<8x32xf32> -> vector<8x32xf32>
    %c0_3 = arith.constant 0 : index
    %c0_4 = arith.constant 0 : index
    %3 = vector.load %arg3[%c0_3, %c0_4] : memref<1x32xf32, #tpu.memory_space<vmem>>, vector<1x32xf32>
    %4 = vector.broadcast %3 : vector<1x32xf32> to vector<8x32xf32>
    %5 = arith.addf %2, %4 : vector<8x32xf32>
    %cst_5 = arith.constant 0.000000e+00 : f32
    %6 = vector.broadcast %cst_5 : f32 to vector<8x32xf32>
    %7 = arith.maximumf %5, %6 : vector<8x32xf32>
    %c0_6 = arith.constant 0 : index
    %c0_7 = arith.constant 0 : index
    %8 = vector.load %arg4[%c0_6, %c0_7] : memref<32x2xf32, #tpu.memory_space<vmem>>, vector<32x2xf32>
    %cst_8 = arith.constant dense<0.000000e+00> : vector<8x2xf32>
    %9 = tpu.matmul %7, %8, %cst_8 {dimension_numbers = #tpu.dot_dimension_numbers<[1], [0], [0], [1], [0, 0, 1, 1], [], []>} : vector<8x32xf32>, vector<32x2xf32>, vector<8x2xf32> -> vector<8x2xf32>
    %c0_9 = arith.constant 0 : index
    %c0_10 = arith.constant 0 : index
    %10 = vector.load %arg5[%c0_9, %c0_10] : memref<1x2xf32, #tpu.memory_space<vmem>>, vector<1x2xf32>
    %11 = vector.broadcast %10 : vector<1x2xf32> to vector<8x2xf32>
    %12 = arith.addf %9, %11 : vector<8x2xf32>
    %c0_11 = arith.constant 0 : index
    %c0_12 = arith.constant 0 : index
    %13 = vector.load %arg6[%c0_11, %c0_12] : memref<8x2xf32, #tpu.memory_space<vmem>>, vector<8x2xf32>
    tpu.vector_store %arg6[%c0_11, %c0_12], %12 {strides = array<i32>} : memref<8x2xf32, #tpu.memory_space<vmem>>, vector<8x2xf32>,
    return
  }
  func.func @transform_0(%arg0: i32) -> (i32, i32) {
    %c0_i32 = arith.constant 0 : i32
    %c0_i32_0 = arith.constant 0 : i32
    return %arg0, %c0_i32 : i32, i32
  }
  func.func @transform_1(%arg0: i32) -> (i32, i32) {
    %c0_i32 = arith.constant 0 : i32
    %c0_i32_0 = arith.constant 0 : i32
    %c0_i32_1 = arith.constant 0 : i32
    return %c0_i32, %c0_i32_0 : i32, i32
  }
  func.func @transform_2(%arg0: i32) -> (i32, i32) {
    %c0_i32 = arith.constant 0 : i32
    %c0_i32_0 = arith.constant 0 : i32
    %c0_i32_1 = arith.constant 0 : i32
    return %c0_i32, %c0_i32_0 : i32, i32
  }
  func.func @transform_3(%arg0: i32) -> (i32, i32) {
    %c0_i32 = arith.constant 0 : i32
    %c0_i32_0 = arith.constant 0 : i32
    %c0_i32_1 = arith.constant 0 : i32
    return %c0_i32, %c0_i32_0 : i32, i32
  }
  func.func @transform_4(%arg0: i32) -> (i32, i32) {
    %c0_i32 = arith.constant 0 : i32
    %c0_i32_0 = arith.constant 0 : i32
    %c0_i32_1 = arith.constant 0 : i32
    return %c0_i32, %c0_i32_0 : i32, i32
  }
  func.func @transform_5(%arg0: i32) -> (i32, i32) {
    %c0_i32 = arith.constant 0 : i32
    %c0_i32_0 = arith.constant 0 : i32
    return %arg0, %c0_i32 : i32, i32
  }
}

</mosaic_0001>

<bundles_post_ra>
// kernel: neural_sentiment_forward.1
= control target key start
LH: loop header
LB: loop body
LE: loop exit
PB: predicated region body
PF: predicated region fallthrough
CT: control target
= control target key end

     0   :  { %10 = vsyncpa [#allocation3], 0  ;;  %s251_s0 = inlined_call_operand.vmem [shape: f32[2,32], index: 0, kind: input, shape index: {}]   ;;  %s252_s1 = inlined_call_operand.vmem [shape: f32[32,32], index: 1, kind: input, shape index: {}]   ;;  %s253_s2 = inlined_call_operand.hbm [shape: f32[1,32], index: 2, kind: input, shape index: {}]   ;;  %s254_s3 = inlined_call_operand.vmem [shape: f32[32,2], index: 3, kind: input, shape index: {}]   ;;  %s255_s4 = inlined_call_operand.vmem [shape: f32[1,2], index: 4, kind: input, shape index: {}]   ;;  %s256_s5 = inlined_call_operand.hbm [shape: f32[2,2], index: 5, kind: output, shape index: {}]  }
   0x1   :  { %11 = vsyncpa [#allocation4], 0  ;;  %s21_s20 = sshll.u32 %s253_s2, 4  ;;  %s181_s21 = smov [#allocation2]   ;;  %s22_s20 = int_to_ptr.hbm [resolvable:$true] %s21_s20 }
   0x2   :  { %s23_s22 = sshll.u32 %s181_s21, 4  ;;  %s24_s22 = int_to_ptr.vmem [resolvable:$true] %s23_s22 }
   0x3   :  { %26 = dma.hbm_to_vmem [thread:$0]  %s22_s20, 16, %s24_s22, [#allocation3]  }
   0x4   :  { %177 = dma.done.wait [#allocation3], 16  }
   0x5   :  { %178 = vsyncadd [#allocation3], 4294967280  ;;  %v39_v0 = vld [vmem:[%s252_s1 + $0x18] sm:$0xff]  ;;  %v38_v1 = vld [vmem:[%s252_s1 + $0x10] sm:$0xff]  ;;  %vm44_vm0 = vcmask 261120   ;;  %vm100_vm1 = vcmask 15360  }
   0x6   :  { %60 = vmatpush.msra.mxu0 %v39_v0  ;;  %v72_v2 = vld [vmem:[%s254_s3 + $0x18] sm:$0xff]  ;;  %v37_v3 = vld [vmem:[%s252_s1 + $0x8] sm:$0xff]  ;;  %v36_v4 = vld [vmem:[%s252_s1] sm:$0xff] }
   0x7   :  { %92 = vmatpush.msra.mxu1 %v72_v2  ;;  %v35_v5 = vld [vmem:[%s251_s0] sm:$0xff]  ;;  %v71_v6 = vld [vmem:[%s254_s3 + $0x10] sm:$0xff]  ;;  %v70_v7 = vld [vmem:[%s254_s3 + $0x8] sm:$0xff] }
   0x8   :  { %61 = vmatpush.msra.mxu0 %v38_v1  ;;  %v69_v8 = vld [vmem:[%s254_s3] sm:$0xff] }
   0x9   :  { %93 = vmatpush.msra.mxu1 %v71_v6  ;;  %v127_v9 = vld [vmem:[#allocation2] ss:$0 sm:$0xff] }
   0xa   :  { %62 = vmatpush.msra.mxu0 %v37_v3  ;;  %v128_v13 = vld [vmem:[%s255_s4] ss:$0 sm:$0xff] }
   0xb   :  { %94 = vmatpush.msra.mxu1 %v70_v7 }
   0xc   :  { %63 = vmatpush.msra.mxu0 %v36_v4 }
   0xd   :  { %121 = vmatmul.msk.f32.vlgmr.msra.gmra.mxu0 %vm44_vm0, %v35_v5  ;;  %95 = vmatpush.msra.mxu1 %v69_v8 }
  0x8a   :  { %v65_v10 = vpop.f32.mrf.mxu0 }
  0x8b   :  { %v66_v11 = vadd.f32 %v127_v9, %v65_v10 }
  0x8d   :  { %v68_v12 = vmax.f32 %v66_v11, 0.0 }
  0x8f   :  { %122 = vmatmul.msk.f32.vlgmr.msra.gmra.mxu1 %vm44_vm0, %v68_v12 }
 0x10c   :  { %v97_v14 = vpop.f32.mrf.mxu1 }
 0x10d   :  { %v98_v15 = vadd.f32 %v128_v13, %v97_v14 }
 0x10f   :  { %101 = vst.msk [vmem:[#allocation5] sm:$0xff] %vm100_vm1, %v98_v15 }
 0x110   :  { %105 = vsyncadd [#allocation4], 96  ;;  %s108_s17 = sshll.u32 %s256_s5, 4  ;;  %s182_s3 = smov [#allocation5]   ;;  %s109_s17 = int_to_ptr.hbm [resolvable:$true] %s108_s17 }
 0x111   :  { %s106_s18 = sshll.u32 %s182_s3, 4  ;;  %s183_s19 = smov 32   ;;  %s107_s18 = int_to_ptr.vmem [resolvable:$true] %s106_s18 }
 0x112   :  { %s184_s20 = smov 2  }
 0x113   :  { %114 = dma.vmem_to_hbm [thread:$0]  %s107_s18, 32, %s109_s17, [#allocation4], %s183_s19, %s183_s19, %s184_s20  }
 0x114   :  { %179 = dma.done.wait [#allocation4], 128  }
 0x115   :  { %180 = vsyncadd [#allocation4], 4294967168 }
 0x116   :  { %119 = vsyncpa [#allocation3], 1 }
 0x117   :  { %120 = vsyncpa [#allocation4], 1 }

</bundles_post_ra>
